<compile_context>
chip_gen: v7x
topology: tpu7x:2x2x1
jax: 0.10.0
libtpu: 0.0.40
codegen_flags: <defaults>
</compile_context>

<pallas_src>
import numpy as np
import jax
import jax.numpy as jnp
from jax.experimental import pallas as pl
from jax.experimental.pallas import tpu as pltpu

# --- C3M "CAR" system constants ---------------------------------------------
NUM_DIM_X = 4
NUM_DIM_CONTROL = 2
EFF_START, EFF_END = 2, 4          # metric depends only on (theta, v)
HIDDEN = 128
W_LB = 0.1                         # trained_model['args'].w_lb (synthetic)
_LANE = 128                        # TPU lane width


# --- constant (param-load-time) preprocessing --------------------------------
def _g_matrices():
    """Selection/summation matrices so G = W^T W becomes matmuls.

    A[16k+4i+j] = W_flat[4k+i],  B[16k+4i+j] = W_flat[4k+j],
    G_flat[4i+j] = sum_k (A*B)[16k+4i+j]   (the S matrix does the sum over k).
    """
    pa = np.zeros((16, 64), np.float32)
    pb = np.zeros((16, 64), np.float32)
    s = np.zeros((64, 16), np.float32)
    for k in range(4):
        for i in range(4):
            for j in range(4):
                o = 16 * k + 4 * i + j
                pa[4 * k + i, o] = 1.0
                pb[4 * k + j, o] = 1.0
                s[o, 4 * i + j] = 1.0
    return pa, pb, s


def prepare_w_func_consts(params):
    """Fold every batch-invariant piece of W_func into kernel constants.

    Everything is stored transposed (features on sublanes, batch on lanes)
    so the kernel's loads/stores are lane-dense.
    """
    # model_Wbot applied to ones(bs,1): identical across the batch -> 2x2 const.
    hb = jnp.clip(params['wb1'] + params['bb1'], -1.0, 1.0)          # (1,128)
    wbot = (hb @ params['wb2']).reshape(2, 2)                        # (2,2)

    # Fold the W assembly into layer 2: zero the columns the assembly
    # overwrites (flat index 4*r+c with c<2) and put wbot into a constant
    # bias at flat lanes {0,1,4,5}; rows r>=2, c<2 stay exactly zero.
    col = np.arange(NUM_DIM_X * NUM_DIM_X) % NUM_DIM_X
    keep = jnp.asarray((col >= 2).astype(np.float32))                # (16,)
    w2_masked = params['w2'] * keep[None, :]                         # (128,16)
    bias = jnp.zeros((NUM_DIM_X * NUM_DIM_X,), jnp.float32)
    bias = bias.at[jnp.array([0, 1, 4, 5])].set(wbot.reshape(-1))

    pa, pb, s = _g_matrices()
    diag = W_LB * np.eye(NUM_DIM_X, dtype=np.float32).reshape(-1)    # (16,)

    return {
        'w1_t':   params['w1'].T,                                    # (128, 2)
        'b1_t':   params['b1'].reshape(HIDDEN, 1),                   # (128, 1)
        'w2m_t':  w2_masked.T,                                       # (16, 128)
        'bias_t': bias.reshape(-1, 1),                               # (16, 1)
        'pa_t':   jnp.asarray(pa.T),                                 # (64, 16)
        'pb_t':   jnp.asarray(pb.T),                                 # (64, 16)
        's_t':    jnp.asarray(s.T),                                  # (16, 64)
        'diag_t': jnp.asarray(diag.reshape(-1, 1)),                  # (16, 1)
    }


# --- Pallas kernel ------------------------------------------------------------
def _w_func_kernel(x_ref, w1_ref, b1_ref, w2_ref, bias_ref,
                   pa_ref, pb_ref, s_ref, diag_ref, m_ref):
    # x_ref: (2, TBL) effective state (theta, v); batch on lanes.
    x = x_ref[...]

    # Layer 1 (K=2): two broadcast FMAs on the VPU; an MXU matmul here would
    # be >98% padding of the systolic depth.
    h = (w1_ref[:, 0:1] * x[0:1, :] +
         w1_ref[:, 1:2] * x[1:2, :] + b1_ref[...])                   # (128, TBL)
    h = jnp.clip(h, -1.0, 1.0)                                       # hardtanh

    # Layer 2 fused with the W assembly (masked w2 + constant wbot bias).
    w = jnp.dot(w2_ref[...], h,
                preferred_element_type=jnp.float32) + bias_ref[...]  # (16, TBL)

    # G = W^T W + w_lb*I via whole-vreg selection matmuls (no cross-lane ops):
    #   A[16k+4i+j] = W[4k+i], B[16k+4i+j] = W[4k+j], G = S @ (A*B) + diag.
    a = jnp.dot(pa_ref[...], w, preferred_element_type=jnp.float32)  # (64, TBL)
    b = jnp.dot(pb_ref[...], w, preferred_element_type=jnp.float32)  # (64, TBL)
    g = jnp.dot(s_ref[...], a * b, preferred_element_type=jnp.float32)
    m_ref[...] = g + diag_ref[...]                                   # (16, TBL)


def w_func_pallas(x_eff_t, consts, *, lane_tile=None):
    """M = W_func(x).reshape(bs, -1).

    x_eff_t: (2, bs) transposed effective state. Returns (bs, 16).
    """
    bs = x_eff_t.shape[1]
    if lane_tile is None:
        lane_tile = min(1024, max(_LANE, pl.cdiv(bs, _LANE) * _LANE))
    bs_pad = pl.cdiv(bs, lane_tile) * lane_tile
    if bs_pad != bs:
        x_eff_t = jnp.pad(x_eff_t, ((0, 0), (0, bs_pad - bs)))
    grid = (bs_pad // lane_tile,)

    def resident(arr):
        return pl.BlockSpec(arr.shape, lambda i, _nd=arr.ndim: (0,) * _nd)

    w_args = (consts['w1_t'], consts['b1_t'], consts['w2m_t'], consts['bias_t'],
              consts['pa_t'], consts['pb_t'], consts['s_t'], consts['diag_t'])

    m_t = pl.pallas_call(
        _w_func_kernel,
        out_shape=jax.ShapeDtypeStruct((NUM_DIM_X * NUM_DIM_X, bs_pad),
                                       jnp.float32),
        grid=grid,
        in_specs=[pl.BlockSpec((2, lane_tile), lambda i: (0, i))] +
                 [resident(a) for a in w_args],
        out_specs=pl.BlockSpec((NUM_DIM_X * NUM_DIM_X, lane_tile),
                               lambda i: (0, i)),
        compiler_params=pltpu.CompilerParams(
            dimension_semantics=("parallel",)),
    )(x_eff_t, *w_args)
    return m_t[:, :bs].T                                             # (bs, 16)


def cert_ver_forward(xall, consts):
    """CertVerModel.forward."""
    bs = xall.shape[0]
    x = xall[:, :NUM_DIM_X, 0]                         # (bs, 4)
    x_eff_t = x[:, EFF_START:EFF_END].T                # (2, bs) layout plumbing
    M = w_func_pallas(x_eff_t, consts)                 # (bs, 16) -- Pallas hot path
    # JacobianOP.apply(M, x): auto_LiRPA's plain forward returns a zeros
    # placeholder of shape (bs, M.flatten(1).shape[1], x.flatten(1).shape[1]);
    # the real Jacobian only materializes during CROWN bound propagation.
    # TODO(synk): CROWN Jacobian bound propagation has no Pallas equivalent.
    jac = jnp.zeros((bs, M.shape[1], NUM_DIM_X), dtype=M.dtype)
    return jac, M


# --- pure-JAX reference for verification -------------------------------------
def w_func_ref(x_eff, p):
    bs = x_eff.shape[0]
    h = jnp.clip(x_eff @ p['w1'] + p['b1'], -1.0, 1.0)
    wflat = h @ p['w2']
    hb = jnp.clip(p['wb1'] + p['bb1'], -1.0, 1.0)
    wbot = (hb @ p['wb2']).reshape(2, 2)
    W = wflat.reshape(bs, 4, 4)
    W = W.at[:, :2, :2].set(wbot[None])
    W = W.at[:, 2:, :2].set(0.0)
    G = jnp.einsum('bki,bkj->bij', W, W) + W_LB * jnp.eye(4, dtype=jnp.float32)
    return G.reshape(bs, 16)


if __name__ == "__main__":
    key = jax.random.PRNGKey(0)
    kx, kp = jax.random.split(key)
    bs = 2

    # xall = concat((x, xref, uref), dim=1) -> (bs, 2*4 + 2, 1)
    xall = jax.random.uniform(
        kx, (bs, 2 * NUM_DIM_X + NUM_DIM_CONTROL, 1), dtype=jnp.float32)

    # Deterministic synthetic weights (shapes from C3M model_CAR).
    ks = jax.random.split(kp, 6)
    params = {
        'w1':  0.5 * jax.random.normal(ks[0], (EFF_END - EFF_START, HIDDEN), jnp.float32),
        'b1':  0.1 * jax.random.normal(ks[1], (1, HIDDEN), jnp.float32),
        'w2':  0.1 * jax.random.normal(ks[2], (HIDDEN, NUM_DIM_X * NUM_DIM_X), jnp.float32),
        'wb1': 0.5 * jax.random.normal(ks[3], (1, HIDDEN), jnp.float32),
        'bb1': 0.1 * jax.random.normal(ks[4], (1, HIDDEN), jnp.float32),
        'wb2': 0.1 * jax.random.normal(
            ks[5], (HIDDEN, (NUM_DIM_X - NUM_DIM_CONTROL) ** 2), jnp.float32),
    }

    # Batch-invariant constant folding (Wbot branch, W assembly, G matrices)
    # happens once at param-load time, outside the jitted forward.
    consts = prepare_w_func_consts(params)

    jac, M = jax.jit(cert_ver_forward)(xall, consts)
    jax.block_until_ready((jac, M))

    M_ref = w_func_ref(xall[:, EFF_START:EFF_END, 0], params)
    assert M.shape == (bs, NUM_DIM_X * NUM_DIM_X)
    assert jac.shape == (bs, NUM_DIM_X * NUM_DIM_X, NUM_DIM_X)
    assert jnp.allclose(M, M_ref, atol=1e-5, rtol=1e-5), "Pallas W_func mismatch"
    print("KERNEL_OK")
</pallas_src>

<mosaic_0001>
module attributes {stable_mosaic.version = 11 : i64} {
  func.func @_w_func_kernel(%arg0: i32, %arg1: memref<2x128xf32, #tpu.memory_space<vmem>>, %arg2: memref<128x2xf32, #tpu.memory_space<vmem>>, %arg3: memref<128x1xf32, #tpu.memory_space<vmem>>, %arg4: memref<16x128xf32, #tpu.memory_space<vmem>>, %arg5: memref<16x1xf32, #tpu.memory_space<vmem>>, %arg6: memref<64x16xf32, #tpu.memory_space<vmem>>, %arg7: memref<64x16xf32, #tpu.memory_space<vmem>>, %arg8: memref<16x64xf32, #tpu.memory_space<vmem>>, %arg9: memref<16x1xf32, #tpu.memory_space<vmem>>, %arg10: memref<16x128xf32, #tpu.memory_space<vmem>>) attributes {dimension_semantics = [#tpu.dimension_semantics<parallel>], iteration_bounds = array<i64: 1>, scalar_prefetch = 0 : i64, scratch_operands = 0 : i64, tpu.core_type = #tpu.core_type<tc>, window_params = [{transform_indices = @transform_0, window_bounds = array<i64: 2, 128>}, {pipeline_mode = #tpu.pipeline_mode<synchronous>, transform_indices = @transform_1, window_bounds = array<i64: 128, 2>}, {pipeline_mode = #tpu.pipeline_mode<synchronous>, transform_indices = @transform_2, window_bounds = array<i64: 128, 1>}, {pipeline_mode = #tpu.pipeline_mode<synchronous>, transform_indices = @transform_3, window_bounds = array<i64: 16, 128>}, {pipeline_mode = #tpu.pipeline_mode<synchronous>, transform_indices = @transform_4, window_bounds = array<i64: 16, 1>}, {pipeline_mode = #tpu.pipeline_mode<synchronous>, transform_indices = @transform_5, window_bounds = array<i64: 64, 16>}, {pipeline_mode = #tpu.pipeline_mode<synchronous>, transform_indices = @transform_6, window_bounds = array<i64: 64, 16>}, {pipeline_mode = #tpu.pipeline_mode<synchronous>, transform_indices = @transform_7, window_bounds = array<i64: 16, 64>}, {pipeline_mode = #tpu.pipeline_mode<synchronous>, transform_indices = @transform_8, window_bounds = array<i64: 16, 1>}, {transform_indices = @transform_9, window_bounds = array<i64: 16, 128>}]} {
    %c0 = arith.constant 0 : index
    %c0_0 = arith.constant 0 : index
    %0 = vector.load %arg1[%c0, %c0_0] : memref<2x128xf32, #tpu.memory_space<vmem>>, vector<2x128xf32>
    %c0_1 = arith.constant 0 : index
    %c0_2 = arith.constant 0 : index
    %1 = vector.load %arg2[%c0_1, %c0_2] : memref<128x2xf32, #tpu.memory_space<vmem>>, vector<128x1xf32>
    %2 = vector.extract_strided_slice %0 {offsets = [0, 0], sizes = [1, 128], strides = [1, 1]} : vector<2x128xf32> to vector<1x128xf32>
    %3 = vector.broadcast %1 : vector<128x1xf32> to vector<128x128xf32>
    %4 = vector.broadcast %2 : vector<1x128xf32> to vector<128x128xf32>
    %5 = arith.mulf %3, %4 : vector<128x128xf32>
    %c0_3 = arith.constant 0 : index
    %c1 = arith.constant 1 : index
    %6 = vector.load %arg2[%c0_3, %c1] : memref<128x2xf32, #tpu.memory_space<vmem>>, vector<128x1xf32>
    %7 = vector.extract_strided_slice %0 {offsets = [1, 0], sizes = [1, 128], strides = [1, 1]} : vector<2x128xf32> to vector<1x128xf32>
    %8 = vector.broadcast %6 : vector<128x1xf32> to vector<128x128xf32>
    %9 = vector.broadcast %7 : vector<1x128xf32> to vector<128x128xf32>
    %10 = arith.mulf %8, %9 : vector<128x128xf32>
    %11 = arith.addf %5, %10 : vector<128x128xf32>
    %c0_4 = arith.constant 0 : index
    %c0_5 = arith.constant 0 : index
    %12 = vector.load %arg3[%c0_4, %c0_5] : memref<128x1xf32, #tpu.memory_space<vmem>>, vector<128x1xf32>
    %13 = vector.broadcast %12 : vector<128x1xf32> to vector<128x128xf32>
    %14 = arith.addf %11, %13 : vector<128x128xf32>
    %cst = arith.constant -1.000000e+00 : f32
    %cst_6 = arith.constant 1.000000e+00 : f32
    %15 = vector.broadcast %cst : f32 to vector<128x128xf32>
    %16 = arith.maximumf %15, %14 : vector<128x128xf32>
    %17 = vector.broadcast %cst_6 : f32 to vector<128x128xf32>
    %18 = arith.minimumf %17, %16 : vector<128x128xf32>
    %c0_7 = arith.constant 0 : index
    %c0_8 = arith.constant 0 : index
    %19 = vector.load %arg4[%c0_7, %c0_8] : memref<16x128xf32, #tpu.memory_space<vmem>>, vector<16x128xf32>
    %cst_9 = arith.constant dense<0.000000e+00> : vector<16x128xf32>
    %20 = tpu.matmul %19, %18, %cst_9 {dimension_numbers = #tpu.dot_dimension_numbers<[1], [0], [0], [1], [0, 0, 1, 1], [], []>} : vector<16x128xf32>, vector<128x128xf32>, vector<16x128xf32> -> vector<16x128xf32>
    %c0_10 = arith.constant 0 : index
    %c0_11 = arith.constant 0 : index
    %21 = vector.load %arg5[%c0_10, %c0_11] : memref<16x1xf32, #tpu.memory_space<vmem>>, vector<16x1xf32>
    %22 = vector.broadcast %21 : vector<16x1xf32> to vector<16x128xf32>
    %23 = arith.addf %20, %22 : vector<16x128xf32>
    %c0_12 = arith.constant 0 : index
    %c0_13 = arith.constant 0 : index
    %24 = vector.load %arg6[%c0_12, %c0_13] : memref<64x16xf32, #tpu.memory_space<vmem>>, vector<64x16xf32>
    %cst_14 = arith.constant dense<0.000000e+00> : vector<64x128xf32>
    %25 = tpu.matmul %24, %23, %cst_14 {dimension_numbers = #tpu.dot_dimension_numbers<[1], [0], [0], [1], [0, 0, 1, 1], [], []>} : vector<64x16xf32>, vector<16x128xf32>, vector<64x128xf32> -> vector<64x128xf32>
    %c0_15 = arith.constant 0 : index
    %c0_16 = arith.constant 0 : index
    %26 = vector.load %arg7[%c0_15, %c0_16] : memref<64x16xf32, #tpu.memory_space<vmem>>, vector<64x16xf32>
    %cst_17 = arith.constant dense<0.000000e+00> : vector<64x128xf32>
    %27 = tpu.matmul %26, %23, %cst_17 {dimension_numbers = #tpu.dot_dimension_numbers<[1], [0], [0], [1], [0, 0, 1, 1], [], []>} : vector<64x16xf32>, vector<16x128xf32>, vector<64x128xf32> -> vector<64x128xf32>
    %c0_18 = arith.constant 0 : index
    %c0_19 = arith.constant 0 : index
    %28 = vector.load %arg8[%c0_18, %c0_19] : memref<16x64xf32, #tpu.memory_space<vmem>>, vector<16x64xf32>
    %29 = arith.mulf %25, %27 : vector<64x128xf32>
    %cst_20 = arith.constant dense<0.000000e+00> : vector<16x128xf32>
    %30 = tpu.matmul %28, %29, %cst_20 {dimension_numbers = #tpu.dot_dimension_numbers<[1], [0], [0], [1], [0, 0, 1, 1], [], []>} : vector<16x64xf32>, vector<64x128xf32>, vector<16x128xf32> -> vector<16x128xf32>
    %c0_21 = arith.constant 0 : index
    %c0_22 = arith.constant 0 : index
    %31 = vector.load %arg9[%c0_21, %c0_22] : memref<16x1xf32, #tpu.memory_space<vmem>>, vector<16x1xf32>
    %32 = vector.broadcast %31 : vector<16x1xf32> to vector<16x128xf32>
    %33 = arith.addf %30, %32 : vector<16x128xf32>
    %c0_23 = arith.constant 0 : index
    %c0_24 = arith.constant 0 : index
    %34 = vector.load %arg10[%c0_23, %c0_24] : memref<16x128xf32, #tpu.memory_space<vmem>>, vector<16x128xf32>
    tpu.vector_store %arg10[%c0_23, %c0_24], %33 {strides = array<i32>} : memref<16x128xf32, #tpu.memory_space<vmem>>, vector<16x128xf32>,
    return
  }
  func.func @transform_0(%arg0: i32) -> (i32, i32) {
    %c0_i32 = arith.constant 0 : i32
    %c0_i32_0 = arith.constant 0 : i32
    return %c0_i32, %arg0 : i32, i32
  }
  func.func @transform_1(%arg0: i32) -> (i32, i32) {
    %c0_i32 = arith.constant 0 : i32
    %c0_i32_0 = arith.constant 0 : i32
    %c0_i32_1 = arith.constant 0 : i32
    return %c0_i32, %c0_i32_0 : i32, i32
  }
  func.func @transform_2(%arg0: i32) -> (i32, i32) {
    %c0_i32 = arith.constant 0 : i32
    %c0_i32_0 = arith.constant 0 : i32
    %c0_i32_1 = arith.constant 0 : i32
    return %c0_i32, %c0_i32_0 : i32, i32
  }
  func.func @transform_3(%arg0: i32) -> (i32, i32) {
    %c0_i32 = arith.constant 0 : i32
    %c0_i32_0 = arith.constant 0 : i32
    %c0_i32_1 = arith.constant 0 : i32
    return %c0_i32, %c0_i32_0 : i32, i32
  }
  func.func @transform_4(%arg0: i32) -> (i32, i32) {
    %c0_i32 = arith.constant 0 : i32
    %c0_i32_0 = arith.constant 0 : i32
    %c0_i32_1 = arith.constant 0 : i32
    return %c0_i32, %c0_i32_0 : i32, i32
  }
  func.func @transform_5(%arg0: i32) -> (i32, i32) {
    %c0_i32 = arith.constant 0 : i32
    %c0_i32_0 = arith.constant 0 : i32
    %c0_i32_1 = arith.constant 0 : i32
    return %c0_i32, %c0_i32_0 : i32, i32
  }
  func.func @transform_6(%arg0: i32) -> (i32, i32) {
    %c0_i32 = arith.constant 0 : i32
    %c0_i32_0 = arith.constant 0 : i32
    %c0_i32_1 = arith.constant 0 : i32
    return %c0_i32, %c0_i32_0 : i32, i32
  }
  func.func @transform_7(%arg0: i32) -> (i32, i32) {
    %c0_i32 = arith.constant 0 : i32
    %c0_i32_0 = arith.constant 0 : i32
    %c0_i32_1 = arith.constant 0 : i32
    return %c0_i32, %c0_i32_0 : i32, i32
  }
  func.func @transform_8(%arg0: i32) -> (i32, i32) {
    %c0_i32 = arith.constant 0 : i32
    %c0_i32_0 = arith.constant 0 : i32
    %c0_i32_1 = arith.constant 0 : i32
    return %c0_i32, %c0_i32_0 : i32, i32
  }
  func.func @transform_9(%arg0: i32) -> (i32, i32) {
    %c0_i32 = arith.constant 0 : i32
    %c0_i32_0 = arith.constant 0 : i32
    return %c0_i32, %arg0 : i32, i32
  }
}

</mosaic_0001>

<bundles_post_ra>
// kernel: cert_ver_forward.1
= control target key start
LH: loop header
LB: loop body
LE: loop exit
PB: predicated region body
PF: predicated region fallthrough
CT: control target
= control target key end

     0   :  { %v1111_v0 = vmov 1   ;;  %v1112_v7 = vmov 0   ;;  %v129_v48 = vlaneseq  ;;  %vm490_vm0 = vcmask 130048   ;;  %s1431_s1 = inlined_call_operand.vmem [shape: f32[128,2], index: 1, kind: input, shape index: {}]   ;;  %s1432_s2 = inlined_call_operand.vmem [shape: f32[128,1], index: 2, kind: input, shape index: {}]   ;;  %s1433_s4 = inlined_call_operand.vmem [shape: f32[16,1], index: 4, kind: input, shape index: {}]   ;;  %s1434_s8 = inlined_call_operand.vmem [shape: f32[16,1], index: 8, kind: input, shape index: {}]   ;;  %s1435_s3 = inlined_call_operand.vmem [shape: f32[16,128], index: 3, kind: input, shape index: {}]   ;;  %s1436_s0 = inlined_call_operand.vmem [shape: f32[2,128], index: 0, kind: input, shape index: {}]   ;;  %s1437_s5 = inlined_call_operand.vmem [shape: f32[64,16], index: 5, kind: input, shape index: {}]   ;;  %s1438_s6 = inlined_call_operand.vmem [shape: f32[64,16], index: 6, kind: input, shape index: {}]   ;;  %s1439_s7 = inlined_call_operand.vmem [shape: f32[16,64], index: 7, kind: input, shape index: {}]   ;;  %s1440_s9 = inlined_call_operand.vmem [shape: f32[16,128], index: 9, kind: output, shape index: {}]  }
   0x1   :  { %1095 = vset.pattern.permute.xlu0 %v1111_v0  ;;  %1093 = vset.pattern.permute.xlu1 %v1111_v0  ;;  %v35_v1 = vld [vmem:[%s1431_s1 + $0x10] sm:$0xff]  ;;  %v33_v2 = vld [vmem:[%s1431_s1] sm:$0xff]  ;;  %v34_v4 = vld [vmem:[%s1431_s1 + $0x8] sm:$0xff]  ;;  %vm779_vm1 = vcmask 523264  }
   0x2   :  { %158 = vperm.xlu0 %1095, %v35_v1   ;;  %150 = vperm.xlu1 %1093, %v33_v2   ;;  %v37_v3 = vld [vmem:[%s1431_s1 + $0x20] sm:$0xff]  ;;  %v39_v5 = vld [vmem:[%s1431_s1 + $0x30] sm:$0xff]  ;;  %v36_v6 = vld [vmem:[%s1431_s1 + $0x18] sm:$0xff]  ;;  %v130_v51 = vshrl.u32 %v129_v48, 7 }
   0x3   :  { %v41_v8 = vld [vmem:[%s1431_s1 + $0x40] sm:$0xff]  ;;  %v43_v9 = vld [vmem:[%s1431_s1 + $0x50] sm:$0xff]  ;;  %v38_v13 = vld [vmem:[%s1431_s1 + $0x28] sm:$0xff] }
   0x4   :  { %v249_v10 = vld [vmem:[%s1432_s2] sm:$0xff]  ;;  %v1201_v12 = vld [vmem:[%s1431_s1 + $0x70] sm:$0xff]  ;;  %v250_v15 = vld [vmem:[%s1432_s2 + $0x8] sm:$0xff]  ;;  %v215_v54 = vsub.s32 1, %v130_v51  ;;  %v131_v55 = vsub.s32 0, %v130_v51 }
   0x5   :  { %v45_v11 = vld [vmem:[%s1431_s1 + $0x60] sm:$0xff]  ;;  %v251_v14 = vld [vmem:[%s1432_s2 + $0x10] sm:$0xff]  ;;  %v252_v16 = vld [vmem:[%s1432_s2 + $0x18] sm:$0xff] }
   0x6   :  { %166 = vperm.xlu0 %1095, %v37_v3   ;;  %154 = vperm.xlu1 %1093, %v34_v4   ;;  %v40_v17 = vld [vmem:[%s1431_s1 + $0x38] sm:$0xff]  ;;  %v254_v18 = vld [vmem:[%s1432_s2 + $0x28] sm:$0xff]  ;;  %v253_v20 = vld [vmem:[%s1432_s2 + $0x20] sm:$0xff] }
   0x7   :  { %v256_v19 = vld [vmem:[%s1432_s2 + $0x38] sm:$0xff]  ;;  %v258_v21 = vld [vmem:[%s1432_s2 + $0x48] sm:$0xff]  ;;  %v395_v25 = vld [vmem:[%s1433_s4] sm:$0xff] }
   0x8   :  { %v260_v22 = vld [vmem:[%s1432_s2 + $0x58] sm:$0xff]  ;;  %v42_v23 = vld [vmem:[%s1431_s1 + $0x48] sm:$0xff]  ;;  %v255_v26 = vld [vmem:[%s1432_s2 + $0x30] sm:$0xff] }
   0x9   :  { %v262_v24 = vld [vmem:[%s1432_s2 + $0x68] sm:$0xff]  ;;  %v767_v27 = vld [vmem:[%s1434_s8] sm:$0xff]  ;;  %v44_v28 = vld [vmem:[%s1431_s1 + $0x58] sm:$0xff] }
   0xa   :  { %174 = vperm.xlu0 %1095, %v39_v5   ;;  %1094 = vset.pattern.permute.xlu1 %v1112_v7  ;;  %v257_v29 = vld [vmem:[%s1432_s2 + $0x40] sm:$0xff]  ;;  %v46_v30 = vld [vmem:[%s1431_s1 + $0x68] sm:$0xff]  ;;  %v259_v31 = vld [vmem:[%s1432_s2 + $0x50] sm:$0xff] }
   0xb   :  { %66 = vperm.xlu1 %1094, %v36_v6   ;;  %v48_v32 = vld [vmem:[%s1431_s1 + $0x78] sm:$0xff]  ;;  %v261_v33 = vld [vmem:[%s1432_s2 + $0x60] sm:$0xff]  ;;  %v263_v36 = vld [vmem:[%s1432_s2 + $0x70] sm:$0xff] }
   0xc   :  { %v264_v39 = vld [vmem:[%s1432_s2 + $0x78] sm:$0xff]  ;;  %v396_v42 = vld [vmem:[%s1433_s4 + $0x8] sm:$0xff]  ;;  %v393_v47 = vld [vmem:[%s1435_s3] sm:$0xff] }
   0xd   :  { %v768_v44 = vld [vmem:[%s1434_s8 + $0x8] sm:$0xff]  ;;  %981 = vmatprep.mubr.f32.mxu0 %v393_v47  ;;  %v32_v56 = vld [vmem:[%s1436_s0] sm:$0x3] }
   0xe   :  { %182 = vperm.xlu0 %1095, %v41_v8   ;;  %v1309_v59 = vrot.slane %v32_v56, %v215_v54  ;;  %v1311_v60 = vrot.slane %v32_v56, %v131_v55 }
   0xf   :  { %1096 = vset.pattern.permute.xlu1 %v1111_v0 }
  0x10   :  { %162 = vperm.xlu1 %1096, %v36_v6  }
  0x12   :  { %190 = vperm.xlu0 %1095, %v43_v9  }
  0x14   :  { %1097 = vset.pattern.permute.xlu1 %v1112_v7 }
  0x15   :  { %267 = vperm.xlu1 %1097, %v249_v10  }
  0x16   :  { %198 = vperm.xlu0 %1095, %v45_v11  }
  0x19   :  { %71 = vperm.xlu1 %1097, %v37_v3  }
  0x1a   :  { %206 = vperm.xlu0 %1095, %v1201_v12  }
  0x1d   :  { %76 = vperm.xlu1 %1097, %v38_v13  }
  0x1e   :  { %1108 = vset.pattern.permute.xlu0 %v1112_v7 }
  0x1f   :  { %51 = vperm.xlu0 %1108, %v33_v2  }
  0x21   :  { %1098 = vset.pattern.permute.xlu1 %v1111_v0 }
  0x22   :  { %170 = vperm.xlu1 %1098, %v38_v13  }
  0x23   :  { %56 = vperm.xlu0 %1108, %v34_v4  }
  0x26   :  { %1099 = vset.pattern.permute.xlu1 %v1112_v7 }
  0x27   :  { %61 = vperm.xlu0 %1108, %v35_v1   ;;  %277 = vperm.xlu1 %1099, %v251_v14  }
  0x2b   :  { %272 = vperm.xlu0 %1108, %v250_v15   ;;  %81 = vperm.xlu1 %1099, %v39_v5  }
  0x2f   :  { %282 = vperm.xlu0 %1108, %v252_v16   ;;  %86 = vperm.xlu1 %1099, %v40_v17  }
  0x33   :  { %292 = vperm.xlu0 %1108, %v254_v18   ;;  %1100 = vset.pattern.permute.xlu1 %v1111_v0 }
  0x34   :  { %178 = vperm.xlu1 %1100, %v40_v17  }
  0x37   :  { %302 = vperm.xlu0 %1108, %v256_v19  }
  0x38   :  { %1101 = vset.pattern.permute.xlu1 %v1112_v7 }
  0x39   :  { %287 = vperm.xlu1 %1101, %v253_v20  }
  0x3b   :  { %312 = vperm.xlu0 %1108, %v258_v21  }
  0x3d   :  { %91 = vperm.xlu1 %1101, %v41_v8  }
  0x3f   :  { %322 = vperm.xlu0 %1108, %v260_v22  }
  0x41   :  { %96 = vperm.xlu1 %1101, %v42_v23  }
  0x43   :  { %332 = vperm.xlu0 %1108, %v262_v24  }
  0x45   :  { %1102 = vset.pattern.permute.xlu1 %v1111_v0 }
  0x46   :  { %186 = vperm.xlu1 %1102, %v42_v23  }
  0x47   :  { %399 = vperm.xlu0 %1108, %v395_v25  }
  0x4a   :  { %1103 = vset.pattern.permute.xlu1 %v1112_v7 }
  0x4b   :  { %297 = vperm.xlu1 %1103, %v255_v26   ;;  %771 = vperm.xlu0 %1108, %v767_v27  }
  0x4f   :  { %101 = vperm.xlu1 %1103, %v43_v9  }
  0x53   :  { %106 = vperm.xlu1 %1103, %v44_v28  }
  0x57   :  { %1104 = vset.pattern.permute.xlu1 %v1111_v0 }
  0x58   :  { %194 = vperm.xlu1 %1104, %v44_v28  }
  0x5c   :  { %1105 = vset.pattern.permute.xlu1 %v1112_v7 }
  0x5d   :  { %307 = vperm.xlu1 %1105, %v257_v29  }
  0x61   :  { %111 = vperm.xlu1 %1105, %v45_v11  }
  0x65   :  { %116 = vperm.xlu1 %1105, %v46_v30  }
  0x69   :  { %1106 = vset.pattern.permute.xlu1 %v1111_v0 }
  0x6a   :  { %202 = vperm.xlu1 %1106, %v46_v30  }
  0x6e   :  { %1107 = vset.pattern.permute.xlu1 %v1112_v7 }
  0x6f   :  { %317 = vperm.xlu1 %1107, %v259_v31  }
  0x73   :  { %121 = vperm.xlu1 %1107, %v1201_v12  }
  0x77   :  { %126 = vperm.xlu1 %1107, %v48_v32  }
  0x7b   :  { %1109 = vset.pattern.permute.xlu1 %v1111_v0 }
  0x7c   :  { %210 = vperm.xlu1 %1109, %v48_v32  }
  0x80   :  { %1110 = vset.pattern.permute.xlu1 %v1112_v7 }
  0x81   :  { %327 = vperm.xlu1 %1110, %v261_v33   ;;  %v151_v34 = vpop.permute.xlu1 %150  ;;  %v159_v35 = vpop.permute.xlu0 %158 }
  0x82   :  { %v217_v0 = vmul.f32 %v1309_v59, %v151_v34  ;;  %v219_v1 = vmul.f32 %v1309_v59, %v159_v35 }
  0x85   :  { %337 = vperm.xlu1 %1110, %v263_v36   ;;  %v155_v37 = vpop.permute.xlu1 %154  ;;  %v167_v38 = vpop.permute.xlu0 %166 }
  0x86   :  { %v218_v6 = vmul.f32 %v1309_v59, %v155_v37  ;;  %v221_v27 = vmul.f32 %v1309_v59, %v167_v38 }
  0x89   :  { %342 = vperm.xlu1 %1110, %v264_v39   ;;  %v1287_v40 = vpop.permute.xlu0 %174 }
  0x8a   :  { %v67_v41 = vpop.permute.xlu1 %66  ;;  %v223_v48 = vmul.f32 %v1309_v59, %v1287_v40 }
  0x8b   :  { %v136_v14 = vmul.f32 %v1311_v60, %v67_v41 }
  0x8d   :  { %404 = vperm.xlu1 %1110, %v396_v42   ;;  %v1292_v43 = vpop.permute.xlu0 %182 }
  0x8f   :  { %v163_v45 = vpop.permute.xlu1 %162 }
  0x90   :  { %v220_v8 = vmul.f32 %v1309_v59, %v163_v45 }
  0x91   :  { %776 = vperm.xlu1 %1110, %v768_v44   ;;  %v1297_v46 = vpop.permute.xlu0 %190 }
  0x92   :  { %v236_v18 = vadd.f32 %v220_v8, %v136_v14 }
  0x94   :  { %v268_v49 = vpop.permute.xlu1 %267 }
  0x95   :  { %v1302_v50 = vpop.permute.xlu0 %198 }
  0x98   :  { %v72_v52 = vpop.permute.xlu1 %71 }
  0x99   :  { %v1304_v53 = vpop.permute.xlu0 %206  ;;  %v137_v28 = vmul.f32 %v1311_v60, %v72_v52 }
  0x9b   :  { %v237_v35 = vadd.f32 %v221_v27, %v137_v28 }
  0x9c   :  { %v77_v57 = vpop.permute.xlu1 %76 }
  0x9d   :  { %v138_v29 = vmul.f32 %v1311_v60, %v77_v57 }
  0x9e   :  { %v52_v58 = vpop.permute.xlu0 %51 }
  0x9f   :  { %v133_v61 = vmul.f32 %v1311_v60, %v52_v58 }
  0xa1   :  { %v171_v62 = vpop.permute.xlu1 %170  ;;  %v233_v2 = vadd.f32 %v217_v0, %v133_v61 }
  0xa2   :  { %v57_v63 = vpop.permute.xlu0 %56  ;;  %v222_v24 = vmul.f32 %v1309_v59, %v171_v62 }
  0xa3   :  { %v134_v3 = vmul.f32 %v1311_v60, %v57_v63  ;;  %v345_v11 = vadd.f32 %v268_v49, %v233_v2 }
  0xa4   :  { %v238_v33 = vadd.f32 %v222_v24, %v138_v29 }
  0xa5   :  { %v234_v10 = vadd.f32 %v218_v6, %v134_v3  ;;  %v867_v19 = vclamps-f32 %v345_v11, 1.0  ;;  %v225_v3 = vmul.f32 %v1309_v59, %v1292_v43 }
  0xa6   :  { %v62_v4 = vpop.permute.xlu0 %61  ;;  %v278_v5 = vpop.permute.xlu1 %277 }
  0xa7   :  { %v135_v7 = vmul.f32 %v1311_v60, %v62_v4 }
  0xa9   :  { %v235_v9 = vadd.f32 %v219_v1, %v135_v7 }
  0xaa   :  { %v273_v12 = vpop.permute.xlu0 %272  ;;  %v82_v13 = vpop.permute.xlu1 %81 }
  0xab   :  { %v346_v15 = vadd.f32 %v273_v12, %v234_v10  ;;  %v347_v16 = vadd.f32 %v278_v5, %v235_v9  ;;  %v139_v49 = vmul.f32 %v1311_v60, %v82_v13 }
  0xad   :  { %v868_v17 = vclamps-f32 %v346_v15, 1.0  ;;  %v869_v25 = vclamps-f32 %v347_v16, 1.0  ;;  %v239_v56 = vadd.f32 %v223_v48, %v139_v49 }
  0xae   :  { %v283_v20 = vpop.permute.xlu0 %282  ;;  %v87_v21 = vpop.permute.xlu1 %86 }
  0xaf   :  { %v348_v22 = vadd.f32 %v283_v20, %v236_v18  ;;  %v1035_v23 = vpack.c.bf16 %v868_v17, %v867_v19  ;;  %v140_v47 = vmul.f32 %v1311_v60, %v87_v21  ;;  %v227_v21 = vmul.f32 %v1309_v59, %v1297_v46 }
  0xb1   :  { %v870_v26 = vclamps-f32 %v348_v22, 1.0  ;;  %1036 = vmatprep.subr.bf16.mxu0 %v1035_v23 }
  0xb2   :  { %1038 = vmatpush3.bf16.msra.mxu0 %v1035_v23  ;;  %v293_v32 = vpop.permute.xlu0 %292 }
  0xb3   :  { %v1039_v30 = vpack.c.bf16 %v870_v26, %v869_v25  ;;  %v179_v31 = vpop.permute.xlu1 %178  ;;  %v350_v34 = vadd.f32 %v293_v32, %v238_v33 }
  0xb4   :  { %v224_v45 = vmul.f32 %v1309_v59, %v179_v31 }
  0xb5   :  { %1040 = vmatprep.subr.bf16.mxu0 %v1039_v30  ;;  %v872_v39 = vclamps-f32 %v350_v34, 1.0 }
  0xb6   :  { %1042 = vmatpush3.bf16.msra.mxu0 %v1039_v30  ;;  %v240_v51 = vadd.f32 %v224_v45, %v140_v47  ;;  %v303_v54 = vpop.permute.xlu0 %302  ;;  %v231_v45 = vmul.f32 %v1309_v59, %v1304_v53  ;;  %v394_v53 = vld [vmem:[%s1435_s3 + $0x8] sm:$0xff] }
  0xb8   :  { %v288_v36 = vpop.permute.xlu1 %287  ;;  %v352_v55 = vadd.f32 %v303_v54, %v240_v51 }
  0xb9   :  { %v349_v37 = vadd.f32 %v288_v36, %v237_v35  ;;  %v229_v36 = vmul.f32 %v1309_v59, %v1302_v50 }
  0xba   :  { %v874_v61 = vclamps-f32 %v352_v55, 1.0  ;;  %v313_v7 = vpop.permute.xlu0 %312 }
  0xbb   :  { %v871_v41 = vclamps-f32 %v349_v37, 1.0 }
  0xbc   :  { %v92_v42 = vpop.permute.xlu1 %91 }
  0xbd   :  { %v1043_v44 = vpack.c.bf16 %v872_v39, %v871_v41  ;;  %v141_v4 = vmul.f32 %v1311_v60, %v92_v42 }
  0xbe   :  { %v323_v22 = vpop.permute.xlu0 %322 }
  0xbf   :  { %1044 = vmatprep.subr.bf16.mxu0 %v1043_v44  ;;  %v241_v9 = vadd.f32 %v225_v3, %v141_v4 }
  0xc0   :  { %v97_v38 = vpop.permute.xlu1 %96  ;;  %1046 = vmatpush3.bf16.msra.mxu0 %v1043_v44 }
  0xc1   :  { %v142_v40 = vmul.f32 %v1311_v60, %v97_v38 }
  0xc2   :  { %v333_v37 = vpop.permute.xlu0 %332 }
  0xc5   :  { %v187_v52 = vpop.permute.xlu1 %186 }
  0xc6   :  { %v226_v2 = vmul.f32 %v1309_v59, %v187_v52 }
  0xc8   :  { %v242_v5 = vadd.f32 %v226_v2, %v142_v40 }
  0xca   :  { %v298_v57 = vpop.permute.xlu1 %297  ;;  %v354_v8 = vadd.f32 %v313_v7, %v242_v5  ;;  %v483_v5 = vld [vmem:[%s1437_s5 + $0x8] sm:$0xff]  ;;  %v485_v7 = vld [vmem:[%s1437_s5 + $0x18] sm:$0xff] }
  0xcb   :  { %v351_v58 = vadd.f32 %v298_v57, %v239_v56 }
  0xcc   :  { %v876_v12 = vclamps-f32 %v354_v8, 1.0  ;;  %v486_v8 = vld [vmem:[%s1437_s5 + $0x20] sm:$0xff] }
  0xcd   :  { %v873_v62 = vclamps-f32 %v351_v58, 1.0 }
  0xce   :  { %v102_v63 = vpop.permute.xlu1 %101 }
  0xcf   :  { %v1047_v0 = vpack.c.bf16 %v874_v61, %v873_v62  ;;  %v143_v18 = vmul.f32 %v1311_v60, %v102_v63 }
  0xd1   :  { %1048 = vmatprep.subr.bf16.mxu0 %v1047_v0  ;;  %v243_v24 = vadd.f32 %v227_v21, %v143_v18  ;;  %v627_v18 = vld [vmem:[%s1438_s6 + $0x38] sm:$0xff] }
  0xd2   :  { %v107_v1 = vpop.permute.xlu1 %106  ;;  %1050 = vmatpush3.bf16.msra.mxu0 %v1047_v0 }
  0xd3   :  { %v144_v43 = vmul.f32 %v1311_v60, %v107_v1  ;;  %v400_v1 = vpop.permute.xlu0 %399 }
  0xd7   :  { %v195_v6 = vpop.permute.xlu1 %194 }
  0xd8   :  { %v228_v17 = vmul.f32 %v1309_v59, %v195_v6  ;;  %v484_v6 = vld [vmem:[%s1437_s5 + $0x10] sm:$0xff] }
  0xda   :  { %v244_v19 = vadd.f32 %v228_v17, %v144_v43  ;;  %v625_v17 = vld [vmem:[%s1438_s6 + $0x28] sm:$0xff]  ;;  %v626_v43 = vld [vmem:[%s1438_s6 + $0x30] sm:$0xff] }
  0xdc   :  { %v308_v10 = vpop.permute.xlu1 %307  ;;  %v356_v23 = vadd.f32 %v323_v22, %v244_v19  ;;  %v757_v19 = vld [vmem:[%s1439_s7] sm:$0xff] }
  0xdd   :  { %v353_v11 = vadd.f32 %v308_v10, %v241_v9  ;;  %v487_v9 = vld [vmem:[%s1437_s5 + $0x28] sm:$0xff]  ;;  %v488_v10 = vld [vmem:[%s1437_s5 + $0x30] sm:$0xff] }
  0xde   :  { %v878_v28 = vclamps-f32 %v356_v23, 1.0 }
  0xdf   :  { %v875_v13 = vclamps-f32 %v353_v11, 1.0  ;;  %v489_v11 = vld [vmem:[%s1437_s5 + $0x38] sm:$0xff] }
  0xe0   :  { %v112_v14 = vpop.permute.xlu1 %111 }
  0xe1   :  { %v1051_v15 = vpack.c.bf16 %v876_v12, %v875_v13  ;;  %v145_v34 = vmul.f32 %v1311_v60, %v112_v14  ;;  %v620_v12 = vld [vmem:[%s1438_s6] sm:$0xff]  ;;  %v621_v13 = vld [vmem:[%s1438_s6 + $0x8] sm:$0xff]  ;;  %v622_v14 = vld [vmem:[%s1438_s6 + $0x10] sm:$0xff] }
  0xe3   :  { %1052 = vmatprep.subr.bf16.mxu0 %v1051_v15  ;;  %v245_v41 = vadd.f32 %v229_v36, %v145_v34 }
  0xe4   :  { %v117_v16 = vpop.permute.xlu1 %116  ;;  %1054 = vmatpush3.bf16.msra.mxu0 %v1051_v15  ;;  %v623_v15 = vld [vmem:[%s1438_s6 + $0x18] sm:$0xff] }
  0xe5   :  { %v146_v33 = vmul.f32 %v1311_v60, %v117_v16  ;;  %v624_v16 = vld [vmem:[%s1438_s6 + $0x20] sm:$0xff] }
  0xe9   :  { %v203_v20 = vpop.permute.xlu1 %202 }
  0xea   :  { %v230_v32 = vmul.f32 %v1309_v59, %v203_v20 }
  0xec   :  { %v246_v35 = vadd.f32 %v230_v32, %v146_v33 }
  0xee   :  { %v318_v25 = vpop.permute.xlu1 %317  ;;  %v358_v39 = vadd.f32 %v333_v37, %v246_v35 }
  0xef   :  { %v355_v26 = vadd.f32 %v318_v25, %v243_v24 }
  0xf0   :  { %v880_v49 = vclamps-f32 %v358_v39, 1.0 }
  0xf1   :  { %v877_v27 = vclamps-f32 %v355_v26, 1.0 }
  0xf2   :  { %v122_v29 = vpop.permute.xlu1 %121 }
  0xf3   :  { %v1055_v30 = vpack.c.bf16 %v878_v28, %v877_v27  ;;  %v147_v44 = vmul.f32 %v1311_v60, %v122_v29 }
  0xf5   :  { %1056 = vmatprep.subr.bf16.mxu0 %v1055_v30  ;;  %v247_v55 = vadd.f32 %v231_v45, %v147_v44 }
  0xf6   :  { %v127_v31 = vpop.permute.xlu1 %126  ;;  %1058 = vmatpush3.bf16.msra.mxu0 %v1055_v30 }
  0xf7   :  { %v148_v52 = vmul.f32 %v1311_v60, %v127_v31 }
  0xfb   :  { %v211_v46 = vpop.permute.xlu1 %210 }
  0xfc   :  { %v232_v47 = vmul.f32 %v1309_v59, %v211_v46  ;;  %v482_v59 = vld [vmem:[%s1437_s5] sm:$0xff] }
  0xfd   :  { %988 = vmatprep.mubr.msk.f32.mxu1 %vm490_vm0, %v482_v59 }
  0xfe   :  { %v248_v56 = vadd.f32 %v232_v47, %v148_v52 }
 0x100   :  { %v328_v42 = vpop.permute.xlu1 %327 }
 0x101   :  { %v357_v38 = vadd.f32 %v328_v42, %v245_v41 }
 0x103   :  { %v879_v48 = vclamps-f32 %v357_v38, 1.0 }
 0x104   :  { %v338_v51 = vpop.permute.xlu1 %337 }
 0x105   :  { %v1059_v54 = vpack.c.bf16 %v880_v49, %v879_v48  ;;  %v359_v50 = vadd.f32 %v338_v51, %v247_v55  ;;  %v758_v51 = vld [vmem:[%s1439_s7 + $0x8] sm:$0xff]  ;;  %v772_v55 = vpop.permute.xlu0 %771 }
 0x107   :  { %1060 = vmatprep.subr.bf16.mxu0 %v1059_v54  ;;  %v881_v61 = vclamps-f32 %v359_v50, 1.0 }
 0x108   :  { %v343_v57 = vpop.permute.xlu1 %342  ;;  %1062 = vmatpush3.bf16.msra.mxu0 %v1059_v54 }
 0x109   :  { %v360_v58 = vadd.f32 %v343_v57, %v248_v56 }
 0x10b   :  { %v882_v62 = vclamps-f32 %v360_v58, 1.0 }
 0x10c   :  { %v405_v60 = vpop.permute.xlu1 %404 }
 0x10d   :  { %v1063_v63 = vpack.c.bf16 %v882_v62, %v881_v61 }
 0x10f   :  { %1064 = vmatprep.subr.bf16.mxu0 %v1063_v63 }
 0x110   :  { %1066 = vmatpush3.bf16.msra.mxu0 %v1063_v63  ;;  %v777_v52 = vpop.permute.xlu1 %776 }
 0x113   :  { %982 = vmatmul.mubr.f32.vlgmr.msra.gmra.mrb[0].mxu0 %v394_v53 }
 0x1e6   :  { %v983_v0 = vpop.f32.mrb[0].mxu0 }
 0x1e7   :  { %v479_v2 = vadd.f32 %v983_v0, %v405_v60  ;;  %v473_v40 = vpop.f32.mrb[1].mxu0 }
 0x1e8   :  { %v474_v3 = vadd.f32 %v473_v40, %v400_v1 }
 0x1ea   :  { %v1067_v4 = vpack.c.bf16 %v479_v2, %v474_v3 }
 0x1ec   :  { %1068 = vmatprep.subr.bf16.mxu1 %v1067_v4 }
 0x1ed   :  { %1070 = vmatpush3.bf16.msra.mxu1 %v1067_v4 }
 0x1ee   :  { %1072 = vmatprep.subr.bf16.mxu1 %v1067_v4 }
 0x1f0   :  { %989 = vmatmul.mubr.msk.f32.vlgmr.msra.gmra.mrb[0].mxu1 %vm490_vm0, %v483_v5 }
 0x1f1   :  { %1074 = vmatpush3.bf16.msra.mxu1 %v1067_v4  ;;  %991 = vmatprep.mubr.msk.f32.mxu1 %vm490_vm0, %v484_v6 }
 0x1f4   :  { %992 = vmatmul.mubr.msk.f32.gmra.mrb[2].mxu1 %vm490_vm0, %v485_v7 }
 0x1f5   :  { %994 = vmatprep.mubr.msk.f32.mxu1 %vm490_vm0, %v486_v8 }
 0x1f8   :  { %995 = vmatmul.mubr.msk.f32.gmra.mrb[4].mxu1 %vm490_vm0, %v487_v9 }
 0x1f9   :  { %997 = vmatprep.mubr.msk.f32.mxu1 %vm490_vm0, %v488_v10 }
 0x1fc   :  { %998 = vmatmul.mubr.msk.f32.gmra.mrb[6].mxu1 %vm490_vm0, %v489_v11 }
 0x1fd   :  { %1004 = vmatprep.mubr.msk.f32.mxu1 %vm490_vm0, %v620_v12 }
 0x200   :  { %1005 = vmatmul.mubr.msk.f32.vlgmr.msra.gmra.mrb[8].mxu1 %vm490_vm0, %v621_v13 }
 0x201   :  { %1007 = vmatprep.mubr.msk.f32.mxu1 %vm490_vm0, %v622_v14 }
 0x204   :  { %1008 = vmatmul.mubr.msk.f32.gmra.mrb[10].mxu1 %vm490_vm0, %v623_v15 }
 0x205   :  { %1010 = vmatprep.mubr.msk.f32.mxu1 %vm490_vm0, %v624_v16 }
 0x208   :  { %1011 = vmatmul.mubr.msk.f32.gmra.mrb[12].mxu1 %vm490_vm0, %v625_v17 }
 0x209   :  { %1013 = vmatprep.mubr.msk.f32.mxu1 %vm490_vm0, %v626_v43 }
 0x20c   :  { %1014 = vmatmul.mubr.msk.f32.gmra.mrb[14].mxu1 %vm490_vm0, %v627_v18 }
 0x20d   :  { %1032 = vmatprep.mubr.msk.f32.mxu1 %vm779_vm1, %v757_v19 }
 0x2c3   :  { %v990_v20 = vpop.f32.mrb[0].mxu1 }
 0x2c4   :  { %v581_v21 = vpop.f32.mrb[1].mxu1 }
 0x2c7   :  { %v993_v22 = vpop.f32.mrb[2].mxu1 }
 0x2c8   :  { %v591_v23 = vpop.f32.mrb[3].mxu1 }
 0x2cb   :  { %v996_v24 = vpop.f32.mrb[4].mxu1 }
 0x2cc   :  { %v601_v25 = vpop.f32.mrb[5].mxu1 }
 0x2cf   :  { %v999_v26 = vpop.f32.mrb[6].mxu1 }
 0x2d0   :  { %v611_v27 = vpop.f32.mrb[7].mxu1 }
 0x2d3   :  { %v1006_v28 = vpop.f32.mrb[8].mxu1 }
 0x2d4   :  { %v760_v29 = vmul.f32 %v1006_v28, %v990_v20  ;;  %v718_v30 = vpop.f32.mrb[9].mxu1 }
 0x2d5   :  { %v759_v31 = vmul.f32 %v718_v30, %v581_v21 }
 0x2d7   :  { %v1075_v32 = vpack.c.bf16 %v760_v29, %v759_v31  ;;  %v1009_v33 = vpop.f32.mrb[10].mxu1 }
 0x2d8   :  { %v762_v34 = vmul.f32 %v1009_v33, %v993_v22  ;;  %v728_v35 = vpop.f32.mrb[11].mxu1 }
 0x2d9   :  { %v761_v46 = vmul.f32 %v728_v35, %v591_v23  ;;  %1076 = vmatprep.subr.bf16.mxu1 %v1075_v32 }
 0x2da   :  { %1078 = vmatpush3.bf16.msra.mxu1 %v1075_v32 }
 0x2db   :  { %v1079_v36 = vpack.c.bf16 %v762_v34, %v761_v46  ;;  %v1012_v37 = vpop.f32.mrb[12].mxu1 }
 0x2dc   :  { %v764_v39 = vmul.f32 %v1012_v37, %v996_v24  ;;  %v738_v41 = vpop.f32.mrb[13].mxu1 }
 0x2dd   :  { %v763_v42 = vmul.f32 %v738_v41, %v601_v25  ;;  %1080 = vmatprep.subr.bf16.mxu1 %v1079_v36 }
 0x2de   :  { %1082 = vmatpush3.bf16.msra.mxu1 %v1079_v36 }
 0x2df   :  { %v1083_v44 = vpack.c.bf16 %v764_v39, %v763_v42  ;;  %v1015_v38 = vpop.f32.mrb[14].mxu1 }
 0x2e0   :  { %v766_v45 = vmul.f32 %v1015_v38, %v999_v26  ;;  %v748_v47 = vpop.f32.mrb[15].mxu1 }
 0x2e1   :  { %v765_v48 = vmul.f32 %v748_v47, %v611_v27  ;;  %1084 = vmatprep.subr.bf16.mxu1 %v1083_v44 }
 0x2e2   :  { %1086 = vmatpush3.bf16.msra.mxu1 %v1083_v44 }
 0x2e3   :  { %v1087_v49 = vpack.c.bf16 %v766_v45, %v765_v48 }
 0x2e5   :  { %1088 = vmatprep.subr.bf16.mxu1 %v1087_v49 }
 0x2e6   :  { %1090 = vmatpush3.bf16.msra.mxu1 %v1087_v49 }
 0x2e9   :  { %1033 = vmatmul.mubr.msk.f32.vlgmr.msra.gmra.mrb[16].mxu1 %vm779_vm1, %v758_v51 }
 0x3bc   :  { %v1034_v54 = vpop.f32.mrb[16].mxu1 }
 0x3bd   :  { %v858_v50 = vadd.f32 %v1034_v54, %v777_v52  ;;  %v852_v56 = vpop.f32.mrb[17].mxu1 }
 0x3be   :  { %v853_v57 = vadd.f32 %v852_v56, %v772_v55 }
 0x3bf   :  { %862 = vst [vmem:[%s1440_s9 + $0x8] sm:$0xff] %v858_v50 }
 0x3c0   :  { %861 = vst [vmem:[%s1440_s9] sm:$0xff] %v853_v57 }

</bundles_post_ra>
